<compile_context>
chip_gen: v6e
topology: v6e:2x2x1
jax: 0.10.0
libtpu: 0.0.40
codegen_flags: <defaults>
</compile_context>

<pallas_src>
import functools

import jax
import jax.numpy as jnp
from jax import lax
from jax.experimental import pallas as pl
from jax.experimental.pallas import tpu as pltpu


K0 = 336           # input feature dim (nn.Linear(336, 512))
H = 512            # hidden width
HEAD_REAL = 9      # 3 heads x 3 logits, packed along the output axis
HEAD_PAD = 16      # packed-head width padded to 16 lanes (== full out last dim)
TILE_B_MAX = 2048  # upper bound on the batch tile (rows)


def _round_up(x, m):
    return ((x + m - 1) // m) * m


def _mapoca_kernel(x_ref, w1_ref, b1_ref, w2_ref, b2_ref, wb_ref, bb_ref,
                   out_ref, *, n_chunks, chunk_rows):
    # Resident weights/biases: constant index maps -> fetched once, live in VMEM.
    w1 = w1_ref[...]
    b1 = b1_ref[...]
    w2 = w2_ref[...]
    b2 = b2_ref[...]
    wb = wb_ref[...]
    bb = bb_ref[...]

    def chunk_body(c, carry):
        r0 = pl.multiple_of(c * chunk_rows, chunk_rows)
        # Cast the fp32 input rows to bf16 in-kernel (MXU-native operand).
        xc = x_ref[pl.ds(r0, chunk_rows), :].astype(jnp.bfloat16)
        # Layer 1: (rows, 336)bf16 @ (336, 512)bf16 -> fp32 acc, + bias, ReLU.
        h1 = jnp.dot(xc, w1, preferred_element_type=jnp.float32)
        h1 = jnp.maximum(h1 + b1, 0.0)
        # Layer 2: (rows, 512)bf16 @ (512, 512)bf16 -> fp32 acc, + bias, ReLU.
        h2 = jnp.dot(h1.astype(jnp.bfloat16), w2,
                     preferred_element_type=jnp.float32)
        h2 = jnp.maximum(h2 + b2, 0.0)
        # Packed branch heads: (rows, 512)bf16 @ (512, 16)bf16 -> fp32.
        o = jnp.dot(h2.astype(jnp.bfloat16), wb,
                    preferred_element_type=jnp.float32)
        out_ref[pl.ds(r0, chunk_rows), :] = (o + bb).astype(out_ref.dtype)
        return carry

    # Statically unrolled so the scheduler can overlap chunk k's epilogue with
    # chunk k+1's matmul pushes.
    lax.fori_loop(0, n_chunks, chunk_body, 0, unroll=True)


@jax.jit
def mapoca_forward(x, params):
    """Fused MAPOCA forward.  Returns a list of three (B, 3) fp32 arrays."""
    w1, b1, w2, b2, wb, bb = params
    B = x.shape[0]

    # Weights: bf16 (MXU native).  Packed heads padded 9 -> 16 output lanes so
    # the head matmul / output block use the full (tiny) last dim.  Biases fp32.
    w1_p = w1.astype(jnp.bfloat16)
    w2_p = w2.astype(jnp.bfloat16)
    wb_p = jnp.pad(wb, ((0, 0), (0, HEAD_PAD - HEAD_REAL))).astype(jnp.bfloat16)
    b1_p = b1.astype(jnp.float32)
    b2_p = b2.astype(jnp.float32)
    bb_p = jnp.pad(bb, ((0, 0), (0, HEAD_PAD - HEAD_REAL))).astype(jnp.float32)

    # ---- balanced batch tiling (no host-side padding of x; Pallas masks the
    # ---- partial last block automatically since rows are independent) ----
    grid_b = pl.cdiv(B, TILE_B_MAX)
    if B >= 64:
        grid_b = max(grid_b, 2)          # >=2 steps so both v7x TCs get work
    align = 16 if B >= 16 else 8         # bf16 packs 16 sublanes per vreg
    tile_b = _round_up(pl.cdiv(B, grid_b), align)
    if tile_b >= 1024:
        n_chunks = 4
    elif tile_b >= 256:
        n_chunks = 2
    else:
        n_chunks = 1
    tile_b = _round_up(tile_b, n_chunks * align)
    grid_b = pl.cdiv(B, tile_b)
    chunk_rows = tile_b // n_chunks

    b_cov = grid_b * tile_b
    flops = 2 * b_cov * (K0 * H + H * H + H * HEAD_PAD)
    bytes_accessed = (
        B * K0 * 4                                  # x (fp32, read in place)
        + (K0 * H + H * H + H * HEAD_PAD) * 2       # bf16 weights
        + (2 * H + HEAD_PAD) * 4                    # fp32 biases
        + B * HEAD_PAD * 4                          # fp32 output
    )

    kernel = functools.partial(
        _mapoca_kernel, n_chunks=n_chunks, chunk_rows=chunk_rows)

    grid_spec = pltpu.PrefetchScalarGridSpec(
        num_scalar_prefetch=0,
        grid=(grid_b,),
        in_specs=[
            pl.BlockSpec((tile_b, K0), lambda i: (i, 0)),   # x tile (fp32)
            pl.BlockSpec((K0, H), lambda i: (0, 0)),        # w1 (resident)
            pl.BlockSpec((1, H), lambda i: (0, 0)),         # b1
            pl.BlockSpec((H, H), lambda i: (0, 0)),         # w2 (resident)
            pl.BlockSpec((1, H), lambda i: (0, 0)),         # b2
            pl.BlockSpec((H, HEAD_PAD), lambda i: (0, 0)),  # packed heads W
            pl.BlockSpec((1, HEAD_PAD), lambda i: (0, 0)),  # packed heads b
        ],
        out_specs=pl.BlockSpec((tile_b, HEAD_PAD), lambda i: (i, 0)),
    )

    out = pl.pallas_call(
        kernel,
        out_shape=jax.ShapeDtypeStruct((B, HEAD_PAD), jnp.float32),
        grid_spec=grid_spec,
        compiler_params=pltpu.CompilerParams(
            dimension_semantics=("parallel",),
            vmem_limit_bytes=48 * 1024 * 1024),
        cost_estimate=pl.CostEstimate(
            flops=flops, transcendentals=0, bytes_accessed=bytes_accessed),
    )(x.astype(jnp.float32), w1_p, b1_p, w2_p, b2_p, wb_p, bb_p)

    out = out[:, :HEAD_REAL]
    return [out[:, 3 * i: 3 * (i + 1)] for i in range(3)]


def init_params(key):
    """Deterministic parameter init matching the PyTorch module's shapes."""
    ks = jax.random.split(key, 8)
    # nn.Linear(336, 512)
    w1 = jax.random.normal(ks[0], (336, 512), jnp.float32) * 0.02
    b1 = jax.random.normal(ks[1], (1, 512), jnp.float32) * 0.01
    # nn.Linear(512, 512)
    w2 = jax.random.normal(ks[2], (512, 512), jnp.float32) * 0.02
    b2 = jax.random.normal(ks[3], (1, 512), jnp.float32) * 0.01
    # three nn.Linear(512, 3) heads, packed along the output axis -> (512, 9)
    wbs = [jax.random.normal(ks[4 + i], (512, 3), jnp.float32) * 0.02 for i in range(3)]
    bbs = [jnp.full((1, 3), 0.001 * (i + 1), jnp.float32) for i in range(3)]
    wb = jnp.concatenate(wbs, axis=1)          # (512, 9)
    bb = jnp.concatenate(bbs, axis=1)          # (1, 9)
    return (w1, b1, w2, b2, wb, bb)


def reference_forward(x, params):
    """Pure-JAX fp32 reference for correctness checking."""
    w1, b1, w2, b2, wb, bb = params
    h = jnp.maximum(x @ w1 + b1, 0.0)
    h = jnp.maximum(h @ w2 + b2, 0.0)
    out = h @ wb + bb
    return [out[:, 3 * i: 3 * (i + 1)] for i in range(3)]


if __name__ == "__main__":
    key = jax.random.PRNGKey(0)
    pkey, xkey = jax.random.split(key)
    params = init_params(pkey)

    B = 8
    x = jax.random.normal(xkey, (B, 336), jnp.float32)

    outs = mapoca_forward(x, params)
    outs = [jax.block_until_ready(o) for o in outs]

    refs = reference_forward(x, params)
    for o, r in zip(outs, refs):
        assert o.shape == (B, 3), o.shape
        # bf16 matmul operands with fp32 accumulation -> loosened tolerance.
        max_err = float(jnp.max(jnp.abs(o - r)))
        assert jnp.allclose(o, r, atol=2e-2, rtol=2e-2), max_err

    print("KERNEL_OK")
</pallas_src>

<mosaic_0001>
module attributes {stable_mosaic.version = 11 : i64} {
  func.func @_mapoca_kernel(%arg0: i32, %arg1: memref<8x336xf32, #tpu.memory_space<vmem>>, %arg2: memref<336x512xbf16, #tpu.memory_space<vmem>>, %arg3: memref<1x512xf32, #tpu.memory_space<vmem>>, %arg4: memref<512x512xbf16, #tpu.memory_space<vmem>>, %arg5: memref<1x512xf32, #tpu.memory_space<vmem>>, %arg6: memref<512x16xbf16, #tpu.memory_space<vmem>>, %arg7: memref<1x16xf32, #tpu.memory_space<vmem>>, %arg8: memref<8x16xf32, #tpu.memory_space<vmem>>) attributes {dimension_semantics = [#tpu.dimension_semantics<parallel>], iteration_bounds = array<i64: 1>, scalar_prefetch = 0 : i64, scratch_operands = 0 : i64, tpu.core_type = #tpu.core_type<tc>, window_params = [{transform_indices = @transform_0, window_bounds = array<i64: 8, 336>}, {pipeline_mode = #tpu.pipeline_mode<synchronous>, transform_indices = @transform_1, window_bounds = array<i64: 336, 512>}, {pipeline_mode = #tpu.pipeline_mode<synchronous>, transform_indices = @transform_2, window_bounds = array<i64: 1, 512>}, {pipeline_mode = #tpu.pipeline_mode<synchronous>, transform_indices = @transform_3, window_bounds = array<i64: 512, 512>}, {pipeline_mode = #tpu.pipeline_mode<synchronous>, transform_indices = @transform_4, window_bounds = array<i64: 1, 512>}, {pipeline_mode = #tpu.pipeline_mode<synchronous>, transform_indices = @transform_5, window_bounds = array<i64: 512, 16>}, {pipeline_mode = #tpu.pipeline_mode<synchronous>, transform_indices = @transform_6, window_bounds = array<i64: 1, 16>}, {transform_indices = @transform_7, window_bounds = array<i64: 8, 16>}]} {
    %c0 = arith.constant 0 : index
    %c0_0 = arith.constant 0 : index
    %0 = vector.load %arg2[%c0, %c0_0] : memref<336x512xbf16, #tpu.memory_space<vmem>>, vector<336x512xbf16>
    %c0_1 = arith.constant 0 : index
    %c0_2 = arith.constant 0 : index
    %1 = vector.load %arg3[%c0_1, %c0_2] : memref<1x512xf32, #tpu.memory_space<vmem>>, vector<1x512xf32>
    %c0_3 = arith.constant 0 : index
    %c0_4 = arith.constant 0 : index
    %2 = vector.load %arg4[%c0_3, %c0_4] : memref<512x512xbf16, #tpu.memory_space<vmem>>, vector<512x512xbf16>
    %c0_5 = arith.constant 0 : index
    %c0_6 = arith.constant 0 : index
    %3 = vector.load %arg5[%c0_5, %c0_6] : memref<1x512xf32, #tpu.memory_space<vmem>>, vector<1x512xf32>
    %c0_7 = arith.constant 0 : index
    %c0_8 = arith.constant 0 : index
    %4 = vector.load %arg6[%c0_7, %c0_8] : memref<512x16xbf16, #tpu.memory_space<vmem>>, vector<512x16xbf16>
    %c0_9 = arith.constant 0 : index
    %c0_10 = arith.constant 0 : index
    %5 = vector.load %arg7[%c0_9, %c0_10] : memref<1x16xf32, #tpu.memory_space<vmem>>, vector<1x16xf32>
    %c0_i32 = arith.constant 0 : i32
    %c8_i32 = arith.constant 8 : i32
    %6 = arith.muli %c0_i32, %c8_i32 : i32
    %7 = tpu.assume_multiple %6, 8 : i32
    %8 = arith.index_cast %7 : i32 to index
    %c0_11 = arith.constant 0 : index
    %9 = vector.load %arg1[%8, %c0_11] : memref<8x336xf32, #tpu.memory_space<vmem>>, vector<8x336xf32>
    %10 = arith.truncf %9 : vector<8x336xf32> to vector<8x336xbf16>
    %cst = arith.constant dense<0.000000e+00> : vector<8x512xf32>
    %11 = tpu.matmul %10, %0, %cst {dimension_numbers = #tpu.dot_dimension_numbers<[1], [0], [0], [1], [0, 0, 1, 1], [], []>} : vector<8x336xbf16>, vector<336x512xbf16>, vector<8x512xf32> -> vector<8x512xf32>
    %12 = vector.broadcast %1 : vector<1x512xf32> to vector<8x512xf32>
    %13 = arith.addf %11, %12 : vector<8x512xf32>
    %cst_12 = arith.constant 0.000000e+00 : f32
    %14 = vector.broadcast %cst_12 : f32 to vector<8x512xf32>
    %15 = arith.maximumf %13, %14 : vector<8x512xf32>
    %16 = arith.truncf %15 : vector<8x512xf32> to vector<8x512xbf16>
    %cst_13 = arith.constant dense<0.000000e+00> : vector<8x512xf32>
    %17 = tpu.matmul %16, %2, %cst_13 {dimension_numbers = #tpu.dot_dimension_numbers<[1], [0], [0], [1], [0, 0, 1, 1], [], []>} : vector<8x512xbf16>, vector<512x512xbf16>, vector<8x512xf32> -> vector<8x512xf32>
    %18 = vector.broadcast %3 : vector<1x512xf32> to vector<8x512xf32>
    %19 = arith.addf %17, %18 : vector<8x512xf32>
    %cst_14 = arith.constant 0.000000e+00 : f32
    %20 = vector.broadcast %cst_14 : f32 to vector<8x512xf32>
    %21 = arith.maximumf %19, %20 : vector<8x512xf32>
    %22 = arith.truncf %21 : vector<8x512xf32> to vector<8x512xbf16>
    %cst_15 = arith.constant dense<0.000000e+00> : vector<8x16xf32>
    %23 = tpu.matmul %22, %4, %cst_15 {dimension_numbers = #tpu.dot_dimension_numbers<[1], [0], [0], [1], [0, 0, 1, 1], [], []>} : vector<8x512xbf16>, vector<512x16xbf16>, vector<8x16xf32> -> vector<8x16xf32>
    %24 = vector.broadcast %5 : vector<1x16xf32> to vector<8x16xf32>
    %25 = arith.addf %23, %24 : vector<8x16xf32>
    %26 = arith.index_cast %7 : i32 to index
    %c0_16 = arith.constant 0 : index
    %27 = vector.load %arg8[%26, %c0_16] : memref<8x16xf32, #tpu.memory_space<vmem>>, vector<8x16xf32>
    tpu.vector_store %arg8[%26, %c0_16], %25 {strides = array<i32>} : memref<8x16xf32, #tpu.memory_space<vmem>>, vector<8x16xf32>,
    %c1_i32 = arith.constant 1 : i32
    return
  }
  func.func @transform_0(%arg0: i32) -> (i32, i32) {
    %c0_i32 = arith.constant 0 : i32
    %c0_i32_0 = arith.constant 0 : i32
    return %arg0, %c0_i32 : i32, i32
  }
  func.func @transform_1(%arg0: i32) -> (i32, i32) {
    %c0_i32 = arith.constant 0 : i32
    %c0_i32_0 = arith.constant 0 : i32
    %c0_i32_1 = arith.constant 0 : i32
    return %c0_i32, %c0_i32_0 : i32, i32
  }
  func.func @transform_2(%arg0: i32) -> (i32, i32) {
    %c0_i32 = arith.constant 0 : i32
    %c0_i32_0 = arith.constant 0 : i32
    %c0_i32_1 = arith.constant 0 : i32
    return %c0_i32, %c0_i32_0 : i32, i32
  }
  func.func @transform_3(%arg0: i32) -> (i32, i32) {
    %c0_i32 = arith.constant 0 : i32
    %c0_i32_0 = arith.constant 0 : i32
    %c0_i32_1 = arith.constant 0 : i32
    return %c0_i32, %c0_i32_0 : i32, i32
  }
  func.func @transform_4(%arg0: i32) -> (i32, i32) {
    %c0_i32 = arith.constant 0 : i32
    %c0_i32_0 = arith.constant 0 : i32
    %c0_i32_1 = arith.constant 0 : i32
    return %c0_i32, %c0_i32_0 : i32, i32
  }
  func.func @transform_5(%arg0: i32) -> (i32, i32) {
    %c0_i32 = arith.constant 0 : i32
    %c0_i32_0 = arith.constant 0 : i32
    %c0_i32_1 = arith.constant 0 : i32
    return %c0_i32, %c0_i32_0 : i32, i32
  }
  func.func @transform_6(%arg0: i32) -> (i32, i32) {
    %c0_i32 = arith.constant 0 : i32
    %c0_i32_0 = arith.constant 0 : i32
    %c0_i32_1 = arith.constant 0 : i32
    return %c0_i32, %c0_i32_0 : i32, i32
  }
  func.func @transform_7(%arg0: i32) -> (i32, i32) {
    %c0_i32 = arith.constant 0 : i32
    %c0_i32_0 = arith.constant 0 : i32
    return %arg0, %c0_i32 : i32, i32
  }
}

</mosaic_0001>

<bundles_post_ra>
// kernel: mapoca_forward.1
= control target key start
LH: loop header
LB: loop body
LE: loop exit
PB: predicated region body
PF: predicated region fallthrough
CT: control target
= control target key end

     0   :  { %v2691_v1 = vmov 0   ;;  %vm756_vm0 = vcmask 654336   ;;  %vm2043_vm1 = vcmask 130048   ;;  %s3523_s1 = inlined_call_operand.vmem [shape: bf16[336,512], index: 1, kind: input, shape index: {}]   ;;  %s3524_s0 = inlined_call_operand.vmem [shape: f32[8,336], index: 0, kind: input, shape index: {}]   ;;  %s3525_s3 = inlined_call_operand.vmem [shape: bf16[512,512], index: 3, kind: input, shape index: {}]   ;;  %s3526_s5 = inlined_call_operand.vmem [shape: bf16[512,16], index: 5, kind: input, shape index: {}]   ;;  %s3527_s2 = inlined_call_operand.vmem [shape: f32[1,512], index: 2, kind: input, shape index: {}]   ;;  %s3528_s4 = inlined_call_operand.vmem [shape: f32[1,512], index: 4, kind: input, shape index: {}]   ;;  %s3529_s6 = inlined_call_operand.vmem [shape: f32[1,16], index: 6, kind: input, shape index: {}]   ;;  %s3530_s7 = inlined_call_operand.vmem [shape: f32[8,16], index: 7, kind: output, shape index: {}]  }
   0x1   :  { %v2341_v0 = vld [vmem:[%s3523_s1 + $0xe4] ss:$16 sps:$4 sm:$0xff]   ;;  %833 = vmatprep.mubr.bf16.mxu1 %v2691_v1  ;;  %v2345_v3 = vld [vmem:[%s3523_s1 + $0xe0] ss:$16 sps:$4 sm:$0xff]   ;;  %v2375_v23 = vld [vmem:[%s3523_s1 + $0xec] ss:$16 sps:$4 sm:$0xff]  }
   0x2   :  { %v2343_v2 = vld [vmem:[%s3523_s1 + $0x284] ss:$16 sps:$4 sm:$0xff]   ;;  %760 = vmatprep.subr.bf16.mxu0 %v2341_v0  ;;  %v2346_v4 = vld [vmem:[%s3523_s1 + $0x280] ss:$16 sps:$4 sm:$0xff]   ;;  %v2373_v25 = vld [vmem:[%s3523_s1 + $0xe8] ss:$16 sps:$4 sm:$0xff]  }
   0x3   :  { %807 = vmatprep.subr.bf16.mxu1 %v2343_v2  ;;  %v2347_v5 = vld [vmem:[%s3523_s1 + $0xc4] ss:$16 sps:$4 sm:$0xff]   ;;  %761 = vmatpush1.bf16.msra.mxu0 %v2345_v3  ;;  %v2351_v7 = vld [vmem:[%s3523_s1 + $0xc0] ss:$16 sps:$4 sm:$0xff]   ;;  %v2381_v28 = vld [vmem:[%s3523_s1 + $0xcc] ss:$16 sps:$4 sm:$0xff]  }
   0x4   :  { %808 = vmatpush1.bf16.msra.mxu1 %v2346_v4  ;;  %v2349_v6 = vld [vmem:[%s3523_s1 + $0x264] ss:$16 sps:$4 sm:$0xff]   ;;  %762 = vmatprep.subr.bf16.mxu0 %v2347_v5  ;;  %v2352_v8 = vld [vmem:[%s3523_s1 + $0x260] ss:$16 sps:$4 sm:$0xff]   ;;  %v2379_v29 = vld [vmem:[%s3523_s1 + $0xc8] ss:$16 sps:$4 sm:$0xff]  }
   0x5   :  { %809 = vmatprep.subr.bf16.mxu1 %v2349_v6  ;;  %v2353_v9 = vld [vmem:[%s3523_s1 + $0xa4] ss:$16 sps:$4 sm:$0xff]   ;;  %v2357_v11 = vld [vmem:[%s3523_s1 + $0xa0] ss:$16 sps:$4 sm:$0xff]   ;;  %v2387_v32 = vld [vmem:[%s3523_s1 + $0xac] ss:$16 sps:$4 sm:$0xff]  }
   0x6   :  { %v2355_v10 = vld [vmem:[%s3523_s1 + $0x244] ss:$16 sps:$4 sm:$0xff]   ;;  %v2358_v12 = vld [vmem:[%s3523_s1 + $0x240] ss:$16 sps:$4 sm:$0xff]   ;;  %v2385_v33 = vld [vmem:[%s3523_s1 + $0xa8] ss:$16 sps:$4 sm:$0xff]  }
   0x7   :  { %763 = vmatpush1.bf16.msra.mxu0 %v2351_v7  ;;  %v2359_v13 = vld [vmem:[%s3523_s1 + $0x84] ss:$16 sps:$4 sm:$0xff]   ;;  %v2363_v15 = vld [vmem:[%s3523_s1 + $0x80] ss:$16 sps:$4 sm:$0xff]   ;;  %v2393_v36 = vld [vmem:[%s3523_s1 + $0x8c] ss:$16 sps:$4 sm:$0xff]  }
   0x8   :  { %810 = vmatpush1.bf16.msra.mxu1 %v2352_v8  ;;  %764 = vmatprep.subr.bf16.mxu0 %v2353_v9  ;;  %v2361_v14 = vld [vmem:[%s3523_s1 + $0x224] ss:$16 sps:$4 sm:$0xff]   ;;  %v2364_v16 = vld [vmem:[%s3523_s1 + $0x220] ss:$16 sps:$4 sm:$0xff]   ;;  %v2391_v37 = vld [vmem:[%s3523_s1 + $0x88] ss:$16 sps:$4 sm:$0xff]  }
   0x9   :  { %811 = vmatprep.subr.bf16.mxu1 %v2355_v10  ;;  %v2365_v17 = vld [vmem:[%s3523_s1 + $0x64] ss:$16 sps:$4 sm:$0xff]   ;;  %v2369_v19 = vld [vmem:[%s3523_s1 + $0x60] ss:$16 sps:$4 sm:$0xff]   ;;  %v2399_v40 = vld [vmem:[%s3523_s1 + $0x6c] ss:$16 sps:$4 sm:$0xff]  }
   0xa   :  { %v2367_v18 = vld [vmem:[%s3523_s1 + $0x204] ss:$16 sps:$4 sm:$0xff]   ;;  %v2370_v20 = vld [vmem:[%s3523_s1 + $0x200] ss:$16 sps:$4 sm:$0xff]   ;;  %v2397_v41 = vld [vmem:[%s3523_s1 + $0x68] ss:$16 sps:$4 sm:$0xff]  }
   0xb   :  { %765 = vmatpush1.bf16.msra.mxu0 %v2357_v11  ;;  %v2371_v21 = vld [vmem:[%s3523_s1 + $0x44] ss:$16 sps:$4 sm:$0xff]   ;;  %v2376_v26 = vld [vmem:[%s3523_s1 + $0x40] ss:$16 sps:$4 sm:$0xff]   ;;  %v2405_v44 = vld [vmem:[%s3523_s1 + $0x4c] ss:$16 sps:$4 sm:$0xff]  }
   0xc   :  { %812 = vmatpush1.bf16.msra.mxu1 %v2358_v12  ;;  %766 = vmatprep.subr.bf16.mxu0 %v2359_v13  ;;  %v311_v22 = vld [vmem:[%s3524_s0 + $0x10] sm:$0xff]  ;;  %v2403_v45 = vld [vmem:[%s3523_s1 + $0x48] ss:$16 sps:$4 sm:$0xff]   ;;  %v2411_v48 = vld [vmem:[%s3523_s1 + $0x2c] ss:$16 sps:$4 sm:$0xff]  }
   0xd   :  { %813 = vmatprep.subr.bf16.mxu1 %v2361_v14  ;;  %v2802_v24 = vpack.c.bf16 %v311_v22, %v311_v22  ;;  %v2377_v27 = vld [vmem:[%s3523_s1 + $0x24] ss:$16 sps:$4 sm:$0xff]   ;;  %v2382_v30 = vld [vmem:[%s3523_s1 + $0x20] ss:$16 sps:$4 sm:$0xff]   ;;  %v2409_v49 = vld [vmem:[%s3523_s1 + $0x28] ss:$16 sps:$4 sm:$0xff]  }
   0xe   :  { %v2383_v31 = vld [vmem:[%s3523_s1 + $0x4] ss:$16 sps:$4 sm:$0xff]   ;;  %v2388_v34 = vld [vmem:[%s3523_s1] ss:$16 sps:$4 sm:$0xff]   ;;  %v310_v50 = vld [vmem:[%s3524_s0 + $0x8] sm:$0xff] }
   0xf   :  { %767 = vmatpush1.bf16.msra.mxu0 %v2363_v15  ;;  %v2389_v35 = vld [vmem:[%s3523_s1 + $0x1e4] ss:$16 sps:$4 sm:$0xff]   ;;  %v2394_v38 = vld [vmem:[%s3523_s1 + $0x1e0] ss:$16 sps:$4 sm:$0xff]   ;;  %v313_v53 = vpack.c.bf16 %v310_v50, %v310_v50  ;;  %v2417_v54 = vld [vmem:[%s3523_s1 + $0xc] ss:$16 sps:$4 sm:$0xff]  }
  0x10   :  { %814 = vmatpush1.bf16.msra.mxu1 %v2364_v16  ;;  %768 = vmatprep.subr.bf16.mxu0 %v2365_v17  ;;  %v2395_v39 = vld [vmem:[%s3523_s1 + $0x1c4] ss:$16 sps:$4 sm:$0xff]   ;;  %v2400_v42 = vld [vmem:[%s3523_s1 + $0x1c0] ss:$16 sps:$4 sm:$0xff]   ;;  %v2415_v55 = vld [vmem:[%s3523_s1 + $0x8] ss:$16 sps:$4 sm:$0xff]  }
  0x11   :  { %815 = vmatprep.subr.bf16.mxu1 %v2367_v18  ;;  %v2401_v43 = vld [vmem:[%s3523_s1 + $0x1a4] ss:$16 sps:$4 sm:$0xff]   ;;  %v2406_v46 = vld [vmem:[%s3523_s1 + $0x1a0] ss:$16 sps:$4 sm:$0xff]   ;;  %792 = vmatprep.mubr.bf16.mxu0 %v313_v53  ;;  %v2423_v58 = vld [vmem:[%s3523_s1 + $0x1ec] ss:$16 sps:$4 sm:$0xff]  }
  0x12   :  { %v2407_v47 = vld [vmem:[%s3523_s1 + $0x184] ss:$16 sps:$4 sm:$0xff]   ;;  %v2412_v51 = vld [vmem:[%s3523_s1 + $0x180] ss:$16 sps:$4 sm:$0xff]   ;;  %v2421_v59 = vld [vmem:[%s3523_s1 + $0x1e8] ss:$16 sps:$4 sm:$0xff]  }
  0x13   :  { %769 = vmatpush1.bf16.msra.mxu0 %v2369_v19  ;;  %v2413_v52 = vld [vmem:[%s3523_s1 + $0x164] ss:$16 sps:$4 sm:$0xff]   ;;  %v2418_v56 = vld [vmem:[%s3523_s1 + $0x160] ss:$16 sps:$4 sm:$0xff]   ;;  %v2429_v62 = vld [vmem:[%s3523_s1 + $0x1cc] ss:$16 sps:$4 sm:$0xff]  }
  0x14   :  { %816 = vmatpush1.bf16.msra.mxu1 %v2370_v20  ;;  %770 = vmatprep.subr.bf16.mxu0 %v2371_v21  ;;  %v2419_v57 = vld [vmem:[%s3523_s1 + $0x144] ss:$16 sps:$4 sm:$0xff]   ;;  %v2424_v60 = vld [vmem:[%s3523_s1 + $0x140] ss:$16 sps:$4 sm:$0xff]   ;;  %v2427_v63 = vld [vmem:[%s3523_s1 + $0x1c8] ss:$16 sps:$4 sm:$0xff]  }
  0x15   :  { %842 = vmatprep.subr.bf16.mxu1 %v2375_v23  ;;  %v2425_v61 = vld [vmem:[%s3523_s1 + $0x124] ss:$16 sps:$4 sm:$0xff]   ;;  %v2430_v0 = vld [vmem:[%s3523_s1 + $0x120] ss:$16 sps:$4 sm:$0xff]   ;;  %v2435_v3 = vld [vmem:[%s3523_s1 + $0x1ac] ss:$16 sps:$4 sm:$0xff]  }
  0x16   :  { %v2431_v2 = vld [vmem:[%s3523_s1 + $0x104] ss:$16 sps:$4 sm:$0xff]   ;;  %v2433_v4 = vld [vmem:[%s3523_s1 + $0x1a8] ss:$16 sps:$4 sm:$0xff]   ;;  %v2436_v5 = vld [vmem:[%s3523_s1 + $0x100] ss:$16 sps:$4 sm:$0xff]  }
  0x17   :  { %2133 = vmatmul.mubr.msk.bf16.vlgmr.msra.gmra.mxu1 %vm756_vm0, %v2802_v24  ;;  %771 = vmatpush1.bf16.msra.mxu0 %v2376_v26  ;;  %v309_v6 = vld [vmem:[%s3524_s0] sm:$0xff]  ;;  %v2439_v7 = vld [vmem:[%s3523_s1 + $0x18c] ss:$16 sps:$4 sm:$0xff]   ;;  %v2437_v9 = vld [vmem:[%s3523_s1 + $0x188] ss:$16 sps:$4 sm:$0xff]  }
  0x18   :  { %843 = vmatpush1.bf16.msra.mxu1 %v2373_v25  ;;  %772 = vmatprep.subr.bf16.mxu0 %v2377_v27  ;;  %v2442_v8 = vld [vmem:[%s3523_s1 + $0x28c] ss:$16 sps:$4 sm:$0xff]   ;;  %v2440_v10 = vld [vmem:[%s3523_s1 + $0x288] ss:$16 sps:$4 sm:$0xff]   ;;  %v312_v11 = vpack.c.bf16 %v309_v6, %v309_v6  ;;  %v2496_v50 = vld [vmem:[%s3525_s3 + $0x4] ss:$16 sps:$4 sm:$0xff]  }
  0x19   :  { %844 = vmatprep.subr.bf16.mxu1 %v2381_v28  ;;  %874 = vmatprep.mubr.bf16.mxu1 %v313_v53  ;;  %v2445_v12 = vld [vmem:[%s3523_s1 + $0x16c] ss:$16 sps:$4 sm:$0xff]   ;;  %v2443_v14 = vld [vmem:[%s3523_s1 + $0x168] ss:$16 sps:$4 sm:$0xff]   ;;  %v2469_v28 = vld [vmem:[%s3525_s3 + $0xe4] ss:$16 sps:$4 sm:$0xff]  }
  0x1a   :  { %v2448_v13 = vld [vmem:[%s3523_s1 + $0x26c] ss:$16 sps:$4 sm:$0xff]   ;;  %v2446_v15 = vld [vmem:[%s3523_s1 + $0x268] ss:$16 sps:$4 sm:$0xff]   ;;  %v2494_v53 = vld [vmem:[%s3525_s3] ss:$16 sps:$4 sm:$0xff]  }
  0x1b   :  { %773 = vmatpush1.bf16.msra.mxu0 %v2382_v30  ;;  %v2451_v16 = vld [vmem:[%s3523_s1 + $0x14c] ss:$16 sps:$4 sm:$0xff]   ;;  %v2449_v18 = vld [vmem:[%s3523_s1 + $0x148] ss:$16 sps:$4 sm:$0xff]   ;;  %v2472_v30 = vld [vmem:[%s3525_s3 + $0xc4] ss:$16 sps:$4 sm:$0xff]  }
  0x1c   :  { %845 = vmatpush1.bf16.msra.mxu1 %v2379_v29  ;;  %774 = vmatprep.subr.bf16.mxu0 %v2383_v31  ;;  %v2454_v17 = vld [vmem:[%s3523_s1 + $0x24c] ss:$16 sps:$4 sm:$0xff]   ;;  %v2452_v19 = vld [vmem:[%s3523_s1 + $0x248] ss:$16 sps:$4 sm:$0xff]   ;;  %v2467_v29 = vld [vmem:[%s3525_s3 + $0xe0] ss:$16 sps:$4 sm:$0xff]  }
  0x1d   :  { %846 = vmatprep.subr.bf16.mxu1 %v2387_v32  ;;  %v2457_v20 = vld [vmem:[%s3523_s1 + $0x12c] ss:$16 sps:$4 sm:$0xff]   ;;  %v2455_v22 = vld [vmem:[%s3523_s1 + $0x128] ss:$16 sps:$4 sm:$0xff]   ;;  %v2470_v31 = vld [vmem:[%s3525_s3 + $0xc0] ss:$16 sps:$4 sm:$0xff]  }
  0x1e   :  { %v2460_v21 = vld [vmem:[%s3523_s1 + $0x22c] ss:$16 sps:$4 sm:$0xff]   ;;  %v2461_v26 = vld [vmem:[%s3523_s1 + $0x108] ss:$16 sps:$4 sm:$0xff]   ;;  %v2475_v32 = vld [vmem:[%s3525_s3 + $0xa4] ss:$16 sps:$4 sm:$0xff]  }
  0x1f   :  { %775 = vmatpush1.bf16.msra.mxu0 %v2388_v34  ;;  %v2463_v23 = vld [vmem:[%s3523_s1 + $0x10c] ss:$16 sps:$4 sm:$0xff]   ;;  %v2464_v27 = vld [vmem:[%s3523_s1 + $0x208] ss:$16 sps:$4 sm:$0xff]   ;;  %v2485_v34 = vld [vmem:[%s3525_s3 + $0x2e0] ss:$16 sps:$4 sm:$0xff]  }
  0x20   :  { %847 = vmatpush1.bf16.msra.mxu1 %v2385_v33  ;;  %776 = vmatprep.subr.bf16.mxu0 %v2389_v35  ;;  %v2466_v25 = vld [vmem:[%s3523_s1 + $0x20c] ss:$16 sps:$4 sm:$0xff]   ;;  %v2473_v33 = vld [vmem:[%s3525_s3 + $0xa0] ss:$16 sps:$4 sm:$0xff]   ;;  %v2487_v35 = vld [vmem:[%s3525_s3 + $0x2e4] ss:$16 sps:$4 sm:$0xff]  }
  0x21   :  { %848 = vmatprep.subr.bf16.mxu1 %v2393_v36  ;;  %v2493_v36 = vld [vmem:[%s3525_s3 + $0x2c4] ss:$16 sps:$4 sm:$0xff]  }
  0x22   :  { %v2526_v6 = vld [vmem:[%s3525_s3 + $0x164] ss:$16 sps:$4 sm:$0xff]  }
  0x23   :  { %777 = vmatpush2.bf16.msra.mxu0 %v2394_v38  ;;  %v2481_v38 = vld [vmem:[%s3525_s3 + $0x64] ss:$16 sps:$4 sm:$0xff]  }
  0x24   :  { %849 = vmatpush1.bf16.msra.mxu1 %v2391_v37  ;;  %778 = vmatprep.subr.bf16.mxu0 %v2395_v39  ;;  %v2476_v37 = vld [vmem:[%s3525_s3 + $0x80] ss:$16 sps:$4 sm:$0xff]  }
  0x25   :  { %850 = vmatprep.subr.bf16.mxu1 %v2399_v40  ;;  %v2491_v39 = vld [vmem:[%s3525_s3 + $0x2c0] ss:$16 sps:$4 sm:$0xff]   ;;  %v2499_v40 = vld [vmem:[%s3525_s3 + $0x2a4] ss:$16 sps:$4 sm:$0xff]  }
  0x27   :  { %779 = vmatpush2.bf16.msra.mxu0 %v2400_v42  ;;  %v2484_v42 = vld [vmem:[%s3525_s3 + $0x44] ss:$16 sps:$4 sm:$0xff]  }
  0x28   :  { %851 = vmatpush1.bf16.msra.mxu1 %v2397_v41  ;;  %780 = vmatprep.subr.bf16.mxu0 %v2401_v43  ;;  %v2479_v41 = vld [vmem:[%s3525_s3 + $0x60] ss:$16 sps:$4 sm:$0xff]  }
  0x29   :  { %852 = vmatprep.subr.bf16.mxu1 %v2405_v44  ;;  %v2497_v43 = vld [vmem:[%s3525_s3 + $0x2a0] ss:$16 sps:$4 sm:$0xff]   ;;  %v2505_v44 = vld [vmem:[%s3525_s3 + $0x284] ss:$16 sps:$4 sm:$0xff]  }
  0x2b   :  { %781 = vmatpush2.bf16.msra.mxu0 %v2406_v46  ;;  %v2490_v46 = vld [vmem:[%s3525_s3 + $0x24] ss:$16 sps:$4 sm:$0xff]  }
  0x2c   :  { %853 = vmatpush1.bf16.msra.mxu1 %v2403_v45  ;;  %782 = vmatprep.subr.bf16.mxu0 %v2407_v47  ;;  %v2482_v45 = vld [vmem:[%s3525_s3 + $0x40] ss:$16 sps:$4 sm:$0xff]  }
  0x2d   :  { %854 = vmatprep.subr.bf16.mxu1 %v2411_v48  ;;  %v2503_v47 = vld [vmem:[%s3525_s3 + $0x280] ss:$16 sps:$4 sm:$0xff]   ;;  %v2511_v48 = vld [vmem:[%s3525_s3 + $0x264] ss:$16 sps:$4 sm:$0xff]  }
  0x2f   :  { %783 = vmatpush2.bf16.msra.mxu0 %v2412_v51  ;;  %v2509_v51 = vld [vmem:[%s3525_s3 + $0x260] ss:$16 sps:$4 sm:$0xff]  }
  0x30   :  { %855 = vmatpush1.bf16.msra.mxu1 %v2409_v49  ;;  %784 = vmatprep.subr.bf16.mxu0 %v2413_v52  ;;  %v2488_v49 = vld [vmem:[%s3525_s3 + $0x20] ss:$16 sps:$4 sm:$0xff]   ;;  %v2517_v52 = vld [vmem:[%s3525_s3 + $0x244] ss:$16 sps:$4 sm:$0xff]  }
  0x31   :  { %856 = vmatprep.subr.bf16.mxu1 %v2417_v54  ;;  %v2502_v54 = vld [vmem:[%s3525_s3 + $0x1e4] ss:$16 sps:$4 sm:$0xff]  }
  0x33   :  { %785 = vmatpush2.bf16.msra.mxu0 %v2418_v56  ;;  %v2523_v56 = vld [vmem:[%s3525_s3 + $0x224] ss:$16 sps:$4 sm:$0xff]  }
  0x34   :  { %857 = vmatpush1.bf16.msra.mxu1 %v2415_v55  ;;  %786 = vmatprep.subr.bf16.mxu0 %v2419_v57  ;;  %v2515_v55 = vld [vmem:[%s3525_s3 + $0x240] ss:$16 sps:$4 sm:$0xff]  }
  0x35   :  { %858 = vmatprep.subr.bf16.mxu1 %v2423_v58  ;;  %v2500_v57 = vld [vmem:[%s3525_s3 + $0x1e0] ss:$16 sps:$4 sm:$0xff]   ;;  %v2508_v58 = vld [vmem:[%s3525_s3 + $0x1c4] ss:$16 sps:$4 sm:$0xff]  }
  0x37   :  { %787 = vmatpush2.bf16.msra.mxu0 %v2424_v60  ;;  %v2529_v60 = vld [vmem:[%s3525_s3 + $0x204] ss:$16 sps:$4 sm:$0xff]  }
  0x38   :  { %859 = vmatpush2.bf16.msra.mxu1 %v2421_v59  ;;  %788 = vmatprep.subr.bf16.mxu0 %v2425_v61  ;;  %v2521_v59 = vld [vmem:[%s3525_s3 + $0x220] ss:$16 sps:$4 sm:$0xff]  }
  0x39   :  { %860 = vmatprep.subr.bf16.mxu1 %v2429_v62  ;;  %v2506_v61 = vld [vmem:[%s3525_s3 + $0x1c0] ss:$16 sps:$4 sm:$0xff]   ;;  %v2514_v62 = vld [vmem:[%s3525_s3 + $0x1a4] ss:$16 sps:$4 sm:$0xff]  }
  0x3b   :  { %789 = vmatpush2.bf16.msra.mxu0 %v2430_v0  ;;  %v2535_v0 = vld [vmem:[%s3525_s3 + $0x3e4] ss:$16 sps:$4 sm:$0xff]  }
  0x3c   :  { %861 = vmatpush2.bf16.msra.mxu1 %v2427_v63  ;;  %790 = vmatprep.subr.bf16.mxu0 %v2431_v2  ;;  %v2527_v63 = vld [vmem:[%s3525_s3 + $0x200] ss:$16 sps:$4 sm:$0xff]  }
  0x3d   :  { %862 = vmatprep.subr.bf16.mxu1 %v2435_v3  ;;  %v2512_v2 = vld [vmem:[%s3525_s3 + $0x1a0] ss:$16 sps:$4 sm:$0xff]   ;;  %v2520_v3 = vld [vmem:[%s3525_s3 + $0x184] ss:$16 sps:$4 sm:$0xff]  }
  0x3f   :  { %791 = vmatpush2.bf16.msra.mxu0 %v2436_v5  ;;  %v2518_v5 = vld [vmem:[%s3525_s3 + $0x180] ss:$16 sps:$4 sm:$0xff]  }
  0x40   :  { %863 = vmatpush2.bf16.msra.mxu1 %v2433_v4  ;;  %889 = vmatprep.subr.bf16.mxu0 %v2442_v8  ;;  %v2533_v4 = vld [vmem:[%s3525_s3 + $0x3e0] ss:$16 sps:$4 sm:$0xff]   ;;  %v2541_v8 = vld [vmem:[%s3525_s3 + $0x3c4] ss:$16 sps:$4 sm:$0xff]  }
  0x41   :  { %864 = vmatprep.subr.bf16.mxu1 %v2439_v7  ;;  %v2524_v7 = vld [vmem:[%s3525_s3 + $0x160] ss:$16 sps:$4 sm:$0xff]  }
  0x42   :  { %793 = vmatmul.mubr.bf16.vlgmr.msra.gmra.mxu0 %v312_v11 }
  0x43   :  { %890 = vmatpush1.bf16.msra.mxu0 %v2440_v10  ;;  %915 = vmatprep.mubr.bf16.mxu0 %v2691_v1  ;;  %v2458_v1 = vld [vmem:[%s3523_s1 + $0x228] ss:$16 sps:$4 sm:$0xff]   ;;  %v2539_v10 = vld [vmem:[%s3525_s3 + $0x3c0] ss:$16 sps:$4 sm:$0xff]  }
  0x44   :  { %865 = vmatpush2.bf16.msra.mxu1 %v2437_v9  ;;  %891 = vmatprep.subr.bf16.mxu0 %v2448_v13  ;;  %v2532_v9 = vld [vmem:[%s3525_s3 + $0x144] ss:$16 sps:$4 sm:$0xff]  }
  0x45   :  { %866 = vmatprep.subr.bf16.mxu1 %v2445_v12  ;;  %v2547_v12 = vld [vmem:[%s3525_s3 + $0x3a4] ss:$16 sps:$4 sm:$0xff]  }
  0x46   :  { %v2538_v13 = vld [vmem:[%s3525_s3 + $0x124] ss:$16 sps:$4 sm:$0xff]  }
  0x47   :  { %892 = vmatpush1.bf16.msra.mxu0 %v2446_v15  ;;  %v2536_v15 = vld [vmem:[%s3525_s3 + $0x120] ss:$16 sps:$4 sm:$0xff]  }
  0x48   :  { %867 = vmatpush2.bf16.msra.mxu1 %v2443_v14  ;;  %893 = vmatprep.subr.bf16.mxu0 %v2454_v17  ;;  %v2545_v14 = vld [vmem:[%s3525_s3 + $0x3a0] ss:$16 sps:$4 sm:$0xff]   ;;  %v2544_v17 = vld [vmem:[%s3525_s3 + $0x104] ss:$16 sps:$4 sm:$0xff]  }
  0x49   :  { %868 = vmatprep.subr.bf16.mxu1 %v2451_v16  ;;  %v2550_v16 = vld [vmem:[%s3525_s3 + $0x384] ss:$16 sps:$4 sm:$0xff]  }
  0x4b   :  { %894 = vmatpush1.bf16.msra.mxu0 %v2452_v19  ;;  %v2542_v19 = vld [vmem:[%s3525_s3 + $0x100] ss:$16 sps:$4 sm:$0xff]  }
  0x4c   :  { %869 = vmatpush2.bf16.msra.mxu1 %v2449_v18  ;;  %895 = vmatprep.subr.bf16.mxu0 %v2460_v21  ;;  %v2548_v18 = vld [vmem:[%s3525_s3 + $0x380] ss:$16 sps:$4 sm:$0xff]   ;;  %v2556_v21 = vld [vmem:[%s3525_s3 + $0x364] ss:$16 sps:$4 sm:$0xff]  }
  0x4d   :  { %870 = vmatprep.subr.bf16.mxu1 %v2457_v20  ;;  %v2554_v20 = vld [vmem:[%s3525_s3 + $0x360] ss:$16 sps:$4 sm:$0xff]  }
  0x4f   :  { %896 = vmatpush1.bf16.msra.mxu0 %v2458_v1  ;;  %v2560_v1 = vld [vmem:[%s3525_s3 + $0x340] ss:$16 sps:$4 sm:$0xff]  }
  0x50   :  { %871 = vmatpush2.bf16.msra.mxu1 %v2455_v22  ;;  %897 = vmatprep.subr.bf16.mxu0 %v2466_v25  ;;  %v2553_v22 = vld [vmem:[%s3525_s3 + $0xec] ss:$16 sps:$4 sm:$0xff]   ;;  %v2568_v25 = vld [vmem:[%s3525_s3 + $0x324] ss:$16 sps:$4 sm:$0xff]  }
  0x51   :  { %872 = vmatprep.subr.bf16.mxu1 %v2463_v23  ;;  %v2562_v23 = vld [vmem:[%s3525_s3 + $0x344] ss:$16 sps:$4 sm:$0xff]  }
  0x53   :  { %898 = vmatpush1.bf16.msra.mxu0 %v2464_v27  ;;  %v2574_v27 = vld [vmem:[%s3525_s3 + $0x304] ss:$16 sps:$4 sm:$0xff]  }
  0x54   :  { %873 = vmatpush2.bf16.msra.mxu1 %v2461_v26  ;;  %1593 = vmatprep.subr.bf16.mxu0 %v2469_v28  ;;  %v2566_v26 = vld [vmem:[%s3525_s3 + $0x320] ss:$16 sps:$4 sm:$0xff]  }
  0x55   :  { %1634 = vmatprep.subr.bf16.mxu1 %v2487_v35  ;;  %v2572_v28 = vld [vmem:[%s3525_s3 + $0x300] ss:$16 sps:$4 sm:$0xff]  }
  0x56   :  { %2134 = vmatmul.mubr.msk.bf16.vlgmr.msra.gmra.mxu0 %vm756_vm0, %v2802_v24  ;;  %v2478_v24 = vld [vmem:[%s3525_s3 + $0x84] ss:$16 sps:$4 sm:$0xff]  }
  0x57   :  { %875 = vmatmul.mubr.bf16.vlgmr.msra.gmra.mxu1 %v312_v11  ;;  %1594 = vmatpush1.bf16.msra.mxu0 %v2467_v29  ;;  %v2530_v11 = vld [vmem:[%s3525_s3 + $0x140] ss:$16 sps:$4 sm:$0xff]   ;;  %v2583_v29 = vld [vmem:[%s3525_s3 + $0x2ec] ss:$16 sps:$4 sm:$0xff]  }
  0x58   :  { %1595 = vmatprep.subr.bf16.mxu0 %v2472_v30  ;;  %1635 = vmatpush1.bf16.msra.mxu1 %v2485_v34 }
  0x59   :  { %1636 = vmatprep.subr.bf16.mxu1 %v2493_v36  ;;  %v111_v36 = vld [vmem:[%s3527_s2] sm:$0xf] }
  0x5b   :  { %1596 = vmatpush1.bf16.msra.mxu0 %v2470_v31 }
  0x5c   :  { %1597 = vmatprep.subr.bf16.mxu0 %v2475_v32  ;;  %1637 = vmatpush1.bf16.msra.mxu1 %v2491_v39 }
  0x5d   :  { %1638 = vmatprep.subr.bf16.mxu1 %v2499_v40 }
  0x5f   :  { %1598 = vmatpush1.bf16.msra.mxu0 %v2473_v33 }
  0x60   :  { %1599 = vmatprep.subr.bf16.mxu0 %v2478_v24  ;;  %1639 = vmatpush1.bf16.msra.mxu1 %v2497_v43  ;;  %v316_v24 = vlaneseq }
  0x61   :  { %1640 = vmatprep.subr.bf16.mxu1 %v2505_v44 }
  0x62   :  { %v3199_v34 = vshrl.u32 %v316_v24, 7  ;;  %v2607_v24 = vld [vmem:[%s3525_s3 + $0x26c] ss:$16 sps:$4 sm:$0xff]  }
  0x63   :  { %1600 = vmatpush1.bf16.msra.mxu0 %v2476_v37 }
  0x64   :  { %1601 = vmatprep.subr.bf16.mxu0 %v2481_v38  ;;  %1641 = vmatpush1.bf16.msra.mxu1 %v2503_v47  ;;  %v318_v35 = vsub.s32 0, %v3199_v34  ;;  %v322_v37 = vsub.s32 1, %v3199_v34 }
  0x65   :  { %1642 = vmatprep.subr.bf16.mxu1 %v2511_v48 }
  0x66   :  { %v319_v38 = vrot.slane %v111_v36, %v318_v35  ;;  %v323_v39 = vrot.slane %v111_v36, %v322_v37 }
  0x67   :  { %1602 = vmatpush1.bf16.msra.mxu0 %v2479_v41 }
  0x68   :  { %1603 = vmatprep.subr.bf16.mxu0 %v2484_v42  ;;  %1643 = vmatpush1.bf16.msra.mxu1 %v2509_v51  ;;  %v2551_v51 = vld [vmem:[%s3525_s3 + $0xe8] ss:$16 sps:$4 sm:$0xff]  }
  0x69   :  { %1644 = vmatprep.subr.bf16.mxu1 %v2517_v52 }
  0x6b   :  { %1604 = vmatpush1.bf16.msra.mxu0 %v2482_v45 }
  0x6c   :  { %1605 = vmatprep.subr.bf16.mxu0 %v2490_v46  ;;  %1645 = vmatpush1.bf16.msra.mxu1 %v2515_v55  ;;  %v326_v55 = vsub.s32 2, %v3199_v34 }
  0x6d   :  { %1646 = vmatprep.subr.bf16.mxu1 %v2523_v56  ;;  %v2565_v56 = vld [vmem:[%s3525_s3 + $0xac] ss:$16 sps:$4 sm:$0xff]  }
  0x6f   :  { %1606 = vmatpush1.bf16.msra.mxu0 %v2488_v49 }
  0x70   :  { %1607 = vmatprep.subr.bf16.mxu0 %v2496_v50  ;;  %1647 = vmatpush1.bf16.msra.mxu1 %v2521_v59  ;;  %v327_v59 = vrot.slane %v111_v36, %v326_v55 }
  0x71   :  { %1648 = vmatprep.subr.bf16.mxu1 %v2529_v60  ;;  %v2571_v60 = vld [vmem:[%s3525_s3 + $0x8c] ss:$16 sps:$4 sm:$0xff]  }
  0x73   :  { %1608 = vmatpush1.bf16.msra.mxu0 %v2494_v53  ;;  %v2559_v53 = vld [vmem:[%s3525_s3 + $0xcc] ss:$16 sps:$4 sm:$0xff]  }
  0x74   :  { %1609 = vmatprep.subr.bf16.mxu0 %v2502_v54  ;;  %1649 = vmatpush1.bf16.msra.mxu1 %v2527_v63  ;;  %v2557_v54 = vld [vmem:[%s3525_s3 + $0xc8] ss:$16 sps:$4 sm:$0xff]  }
  0x75   :  { %1650 = vmatprep.subr.bf16.mxu1 %v2535_v0 }
  0x77   :  { %1610 = vmatpush2.bf16.msra.mxu0 %v2500_v57  ;;  %v330_v57 = vsub.s32 3, %v3199_v34 }
  0x78   :  { %1611 = vmatprep.subr.bf16.mxu0 %v2508_v58  ;;  %1651 = vmatpush2.bf16.msra.mxu1 %v2533_v4  ;;  %v2563_v58 = vld [vmem:[%s3525_s3 + $0xa8] ss:$16 sps:$4 sm:$0xff]  }
  0x79   :  { %1652 = vmatprep.subr.bf16.mxu1 %v2541_v8 }
  0x7b   :  { %1612 = vmatpush2.bf16.msra.mxu0 %v2506_v61  ;;  %v331_v61 = vrot.slane %v111_v36, %v330_v57  ;;  %v2602_v36 = vld [vmem:[%s3525_s3 + $0x1c8] ss:$16 sps:$4 sm:$0xff]  }
  0x7c   :  { %1613 = vmatprep.subr.bf16.mxu0 %v2514_v62  ;;  %1653 = vmatpush2.bf16.msra.mxu1 %v2539_v10 }
  0x7d   :  { %1654 = vmatprep.subr.bf16.mxu1 %v2547_v12 }
  0x7f   :  { %1614 = vmatpush2.bf16.msra.mxu0 %v2512_v2  ;;  %v2569_v2 = vld [vmem:[%s3525_s3 + $0x88] ss:$16 sps:$4 sm:$0xff]  }
  0x80   :  { %1615 = vmatprep.subr.bf16.mxu0 %v2520_v3  ;;  %1655 = vmatpush2.bf16.msra.mxu1 %v2545_v14 }
  0x81   :  { %1656 = vmatprep.subr.bf16.mxu1 %v2550_v16 }
  0x83   :  { %1616 = vmatpush2.bf16.msra.mxu0 %v2518_v5  ;;  %v2577_v5 = vld [vmem:[%s3525_s3 + $0x6c] ss:$16 sps:$4 sm:$0xff]  }
  0x84   :  { %1617 = vmatprep.subr.bf16.mxu0 %v2526_v6  ;;  %1657 = vmatpush2.bf16.msra.mxu1 %v2548_v18  ;;  %v2578_v18 = vld [vmem:[%s3525_s3 + $0x48] ss:$16 sps:$4 sm:$0xff]  }
  0x85   :  { %1658 = vmatprep.subr.bf16.mxu1 %v2556_v21  ;;  %v2586_v21 = vld [vmem:[%s3525_s3 + $0x2c] ss:$16 sps:$4 sm:$0xff]  }
  0x87   :  { %1618 = vmatpush2.bf16.msra.mxu0 %v2524_v7 }
  0x88   :  { %1619 = vmatprep.subr.bf16.mxu0 %v2532_v9  ;;  %1659 = vmatpush2.bf16.msra.mxu1 %v2554_v20 }
  0x89   :  { %1660 = vmatprep.subr.bf16.mxu1 %v2562_v23  ;;  %v2587_v23 = vld [vmem:[%s3525_s3 + $0x2c8] ss:$16 sps:$4 sm:$0xff]  }
  0x8b   :  { %1620 = vmatpush2.bf16.msra.mxu0 %v2530_v11  ;;  %v2575_v11 = vld [vmem:[%s3525_s3 + $0x68] ss:$16 sps:$4 sm:$0xff]  }
  0x8c   :  { %1621 = vmatprep.subr.bf16.mxu0 %v2538_v13  ;;  %1661 = vmatpush2.bf16.msra.mxu1 %v2560_v1  ;;  %v2584_v1 = vld [vmem:[%s3525_s3 + $0x28] ss:$16 sps:$4 sm:$0xff]  }
  0x8d   :  { %1662 = vmatprep.subr.bf16.mxu1 %v2568_v25  ;;  %v2592_v25 = vld [vmem:[%s3525_s3 + $0xc] ss:$16 sps:$4 sm:$0xff]  }
  0x8f   :  { %1622 = vmatpush2.bf16.msra.mxu0 %v2536_v15  ;;  %v2580_v15 = vld [vmem:[%s3525_s3 + $0x4c] ss:$16 sps:$4 sm:$0xff]  }
  0x90   :  { %1623 = vmatprep.subr.bf16.mxu0 %v2544_v17  ;;  %1663 = vmatpush2.bf16.msra.mxu1 %v2566_v26  ;;  %v2595_v26 = vld [vmem:[%s3525_s3 + $0x2ac] ss:$16 sps:$4 sm:$0xff]  }
  0x91   :  { %1664 = vmatprep.subr.bf16.mxu1 %v2574_v27  ;;  %v2590_v27 = vld [vmem:[%s3525_s3 + $0x8] ss:$16 sps:$4 sm:$0xff]  }
  0x93   :  { %1624 = vmatpush2.bf16.msra.mxu0 %v2542_v19  ;;  %v2581_v19 = vld [vmem:[%s3525_s3 + $0x2e8] ss:$16 sps:$4 sm:$0xff]  }
  0x94   :  { %1675 = vmatprep.subr.bf16.mxu0 %v2553_v22  ;;  %1665 = vmatpush2.bf16.msra.mxu1 %v2572_v28  ;;  %v2589_v22 = vld [vmem:[%s3525_s3 + $0x2cc] ss:$16 sps:$4 sm:$0xff]   ;;  %v2593_v28 = vld [vmem:[%s3525_s3 + $0x2a8] ss:$16 sps:$4 sm:$0xff]  }
  0x95   :  { %1716 = vmatprep.subr.bf16.mxu1 %v2583_v29  ;;  %v2598_v29 = vld [vmem:[%s3525_s3 + $0x1ec] ss:$16 sps:$4 sm:$0xff]  }
  0xd7   :  { %v835_v30 = vpop.f32.mrf.mxu1 }
  0xd9   :  { %v837_v31 = vpop.f32.mrf.mxu1 }
  0xdb   :  { %v839_v32 = vpop.f32.mrf.mxu1 }
  0xdc   :  { %v2599_v32 = vld [vmem:[%s3525_s3 + $0x288] ss:$16 sps:$4 sm:$0xff]  }
  0xdd   :  { %v840_v33 = vpop.f32.mrf.mxu1 }
  0xde   :  { %v2604_v33 = vld [vmem:[%s3525_s3 + $0x1cc] ss:$16 sps:$4 sm:$0xff]  }
 0x102   :  { %v794_v40 = vpop.f32.mrf.mxu0 }
 0x103   :  { %v795_v41 = vadd.f32 %v794_v40, %v319_v38  ;;  %v2605_v38 = vld [vmem:[%s3525_s3 + $0x268] ss:$16 sps:$4 sm:$0xff]   ;;  %v2613_v40 = vld [vmem:[%s3525_s3 + $0x24c] ss:$16 sps:$4 sm:$0xff]  }
 0x104   :  { %v796_v42 = vpop.f32.mrf.mxu0 }
 0x105   :  { %v836_v43 = vadd.f32 %v835_v30, %v795_v41  ;;  %v797_v44 = vadd.f32 %v796_v42, %v323_v39  ;;  %v2601_v30 = vld [vmem:[%s3525_s3 + $0x28c] ss:$16 sps:$4 sm:$0xff]   ;;  %v2608_v41 = vld [vmem:[%s3525_s3 + $0x1a8] ss:$16 sps:$4 sm:$0xff]  }
 0x106   :  { %v798_v45 = vpop.f32.mrf.mxu0  ;;  %v2610_v39 = vld [vmem:[%s3525_s3 + $0x1ac] ss:$16 sps:$4 sm:$0xff]   ;;  %v2611_v42 = vld [vmem:[%s3525_s3 + $0x248] ss:$16 sps:$4 sm:$0xff]  }
 0x107   :  { %v838_v46 = vadd.f32 %v837_v31, %v797_v44  ;;  %v924_v47 = vmax.f32 %v836_v43, 0.0  ;;  %v2596_v31 = vld [vmem:[%s3525_s3 + $0x1e8] ss:$16 sps:$4 sm:$0xff]   ;;  %v2616_v43 = vld [vmem:[%s3525_s3 + $0x18c] ss:$16 sps:$4 sm:$0xff]  }
 0x108   :  { %v799_v48 = vpop.f32.mrf.mxu0  ;;  %v2619_v44 = vld [vmem:[%s3525_s3 + $0x22c] ss:$16 sps:$4 sm:$0xff]   ;;  %v2614_v45 = vld [vmem:[%s3525_s3 + $0x188] ss:$16 sps:$4 sm:$0xff]  }
 0x109   :  { %v925_v49 = vmax.f32 %v838_v46, 0.0  ;;  %v3213_v52 = vpack.c.bf16 %v924_v47, %v924_v47  ;;  %v2617_v46 = vld [vmem:[%s3525_s3 + $0x228] ss:$16 sps:$4 sm:$0xff]   ;;  %v2622_v47 = vld [vmem:[%s3525_s3 + $0x16c] ss:$16 sps:$4 sm:$0xff]  }
 0x10a   :  { %v2625_v48 = vld [vmem:[%s3525_s3 + $0x20c] ss:$16 sps:$4 sm:$0xff]  }
 0x10b   :  { %v929_v50 = vpack.c.bf16 %v925_v49, %v925_v49  ;;  %v2620_v49 = vld [vmem:[%s3525_s3 + $0x168] ss:$16 sps:$4 sm:$0xff]  }
 0x10d   :  { %1625 = vmatprep.mubr.bf16.mxu0 %v929_v50 }
 0x10e   :  { %1626 = vmatmul.mubr.bf16.vlgmr.msra.gmra.mxu0 %v3213_v52 }
 0x10f   :  { %1676 = vmatpush1.bf16.msra.mxu0 %v2551_v51  ;;  %1707 = vmatprep.mubr.bf16.mxu0 %v929_v50  ;;  %v2623_v50 = vld [vmem:[%s3525_s3 + $0x208] ss:$16 sps:$4 sm:$0xff]   ;;  %v2628_v51 = vld [vmem:[%s3525_s3 + $0x14c] ss:$16 sps:$4 sm:$0xff]  }
 0x110   :  { %1677 = vmatprep.subr.bf16.mxu0 %v2559_v53  ;;  %v2631_v53 = vld [vmem:[%s3525_s3 + $0x3ec] ss:$16 sps:$4 sm:$0xff]  }
 0x113   :  { %1678 = vmatpush1.bf16.msra.mxu0 %v2557_v54  ;;  %v2626_v54 = vld [vmem:[%s3525_s3 + $0x148] ss:$16 sps:$4 sm:$0xff]  }
 0x114   :  { %1679 = vmatprep.subr.bf16.mxu0 %v2565_v56  ;;  %v2629_v56 = vld [vmem:[%s3525_s3 + $0x3e8] ss:$16 sps:$4 sm:$0xff]  }
 0x116   :  { %v917_v63 = vpop.f32.mrf.mxu0 }
 0x117   :  { %v876_v62 = vpop.f32.mrf.mxu1  ;;  %1680 = vmatpush1.bf16.msra.mxu0 %v2563_v58  ;;  %v2634_v58 = vld [vmem:[%s3525_s3 + $0x12c] ss:$16 sps:$4 sm:$0xff]  }
 0x118   :  { %v877_v0 = vadd.f32 %v876_v62, %v327_v59  ;;  %v919_v4 = vpop.f32.mrf.mxu0  ;;  %1681 = vmatprep.subr.bf16.mxu0 %v2571_v60  ;;  %v2637_v59 = vld [vmem:[%s3525_s3 + $0x3cc] ss:$16 sps:$4 sm:$0xff]   ;;  %v2632_v60 = vld [vmem:[%s3525_s3 + $0x128] ss:$16 sps:$4 sm:$0xff]  }
 0x119   :  { %v878_v3 = vpop.f32.mrf.mxu1  ;;  %v2640_v62 = vld [vmem:[%s3525_s3 + $0x10c] ss:$16 sps:$4 sm:$0xff]  }
 0x11a   :  { %v918_v6 = vadd.f32 %v917_v63, %v877_v0  ;;  %v879_v7 = vadd.f32 %v878_v3, %v331_v61  ;;  %v921_v9 = vpop.f32.mrf.mxu0  ;;  %v2635_v61 = vld [vmem:[%s3525_s3 + $0x3c8] ss:$16 sps:$4 sm:$0xff]   ;;  %v2643_v63 = vld [vmem:[%s3525_s3 + $0x3ac] ss:$16 sps:$4 sm:$0xff]  }
 0x11b   :  { %v880_v8 = vpop.f32.mrf.mxu1  ;;  %1682 = vmatpush1.bf16.msra.mxu0 %v2569_v2  ;;  %v2638_v0 = vld [vmem:[%s3525_s3 + $0x108] ss:$16 sps:$4 sm:$0xff]   ;;  %v2646_v3 = vld [vmem:[%s3525_s3 + $0x38c] ss:$16 sps:$4 sm:$0xff]   ;;  %v2661_v9 = vld [vmem:[%s3526_s5 + $0x70] sm:$0xff]  }
 0x11c   :  { %v920_v10 = vadd.f32 %v919_v4, %v879_v7  ;;  %v926_v12 = vmax.f32 %v918_v6, 0.0  ;;  %v922_v14 = vpop.f32.mrf.mxu0  ;;  %1683 = vmatprep.subr.bf16.mxu0 %v2577_v5  ;;  %v2641_v2 = vld [vmem:[%s3525_s3 + $0x3a8] ss:$16 sps:$4 sm:$0xff]   ;;  %v2649_v7 = vld [vmem:[%s3525_s3 + $0x36c] ss:$16 sps:$4 sm:$0xff]  }
 0x11d   :  { %v881_v13 = vpop.f32.mrf.mxu1  ;;  %v2659_v4 = vld [vmem:[%s3526_s5 + $0x78] sm:$0xff]   ;;  %v2664_v14 = vld [vmem:[%s3526_s5 + $0x28] sm:$0xff]  }
 0x11e   :  { %v927_v16 = vmax.f32 %v920_v10, 0.0  ;;  %v3255_v20 = vpack.c.bf16 %v926_v12, %v926_v12  ;;  %v2644_v5 = vld [vmem:[%s3525_s3 + $0x388] ss:$16 sps:$4 sm:$0xff]   ;;  %v2652_v10 = vld [vmem:[%s3525_s3 + $0x34c] ss:$16 sps:$4 sm:$0xff]  }
 0x11f   :  { %1684 = vmatpush1.bf16.msra.mxu0 %v2575_v11  ;;  %v2660_v6 = vld [vmem:[%s3526_s5 + $0x38] sm:$0xff]   ;;  %v2662_v11 = vld [vmem:[%s3526_s5 + $0x30] sm:$0xff]   ;;  %v2663_v12 = vld [vmem:[%s3526_s5 + $0x68] sm:$0xff]  }
 0x120   :  { %v931_v17 = vpack.c.bf16 %v927_v16, %v927_v16  ;;  %1685 = vmatprep.subr.bf16.mxu0 %v2580_v15  ;;  %v2647_v8 = vld [vmem:[%s3525_s3 + $0x368] ss:$16 sps:$4 sm:$0xff]   ;;  %v2655_v13 = vld [vmem:[%s3525_s3 + $0x32c] ss:$16 sps:$4 sm:$0xff]   ;;  %v2665_v15 = vld [vmem:[%s3526_s5 + $0x60] sm:$0xff]  }
 0x121   :  { %v2653_v16 = vld [vmem:[%s3525_s3 + $0x328] ss:$16 sps:$4 sm:$0xff]  }
 0x122   :  { %1666 = vmatprep.mubr.bf16.mxu1 %v931_v17 }
 0x123   :  { %1667 = vmatmul.mubr.bf16.vlgmr.msra.gmra.mxu1 %v3255_v20  ;;  %1686 = vmatpush1.bf16.msra.mxu0 %v2578_v18  ;;  %v2658_v18 = vld [vmem:[%s3525_s3 + $0x30c] ss:$16 sps:$4 sm:$0xff]  }
 0x124   :  { %1717 = vmatpush1.bf16.msra.mxu1 %v2581_v19  ;;  %1748 = vmatprep.mubr.bf16.mxu1 %v931_v17  ;;  %v2666_v17 = vld [vmem:[%s3526_s5 + $0x20] sm:$0xff]   ;;  %v2667_v19 = vld [vmem:[%s3526_s5 + $0x58] sm:$0xff]  }
 0x125   :  { %1687 = vmatprep.subr.bf16.mxu0 %v2586_v21  ;;  %1718 = vmatprep.subr.bf16.mxu1 %v2589_v22  ;;  %v2656_v21 = vld [vmem:[%s3525_s3 + $0x308] ss:$16 sps:$4 sm:$0xff]  }
 0x126   :  { %v2668_v22 = vld [vmem:[%s3526_s5 + $0x18] sm:$0xff]  }
 0x127   :  { %1688 = vmatpush1.bf16.msra.mxu0 %v2584_v1  ;;  %v2669_v1 = vld [vmem:[%s3526_s5 + $0x50] sm:$0xff]  }
 0x128   :  { %1719 = vmatpush1.bf16.msra.mxu1 %v2587_v23  ;;  %1689 = vmatprep.subr.bf16.mxu0 %v2592_v25  ;;  %v2670_v23 = vld [vmem:[%s3526_s5 + $0x10] sm:$0xff]   ;;  %v2671_v25 = vld [vmem:[%s3526_s5 + $0x48] sm:$0xff]  }
 0x129   :  { %1720 = vmatprep.subr.bf16.mxu1 %v2595_v26  ;;  %v2672_v26 = vld [vmem:[%s3526_s5 + $0x8] sm:$0xff]  }
 0x12b   :  { %1690 = vmatpush1.bf16.msra.mxu0 %v2590_v27  ;;  %v2673_v27 = vld [vmem:[%s3526_s5 + $0x40] sm:$0xff]  }
 0x12c   :  { %1721 = vmatpush1.bf16.msra.mxu1 %v2593_v28  ;;  %1691 = vmatprep.subr.bf16.mxu0 %v2598_v29  ;;  %v2674_v28 = vld [vmem:[%s3526_s5] sm:$0xff]   ;;  %v2676_v29 = vld [vmem:[%s3526_s5 + $0xb8] sm:$0xff]  }
 0x12d   :  { %1722 = vmatprep.subr.bf16.mxu1 %v2601_v30  ;;  %v2677_v30 = vld [vmem:[%s3526_s5 + $0xf0] sm:$0xff]  }
 0x12f   :  { %1692 = vmatpush2.bf16.msra.mxu0 %v2596_v31  ;;  %v2678_v31 = vld [vmem:[%s3526_s5 + $0xb0] sm:$0xff]  }
 0x130   :  { %1723 = vmatpush1.bf16.msra.mxu1 %v2599_v32  ;;  %1693 = vmatprep.subr.bf16.mxu0 %v2604_v33  ;;  %v2679_v32 = vld [vmem:[%s3526_s5 + $0xe8] sm:$0xff]  }
 0x131   :  { %1724 = vmatprep.subr.bf16.mxu1 %v2607_v24  ;;  %v2680_v33 = vld [vmem:[%s3526_s5 + $0xa8] sm:$0xff]   ;;  %v2681_v24 = vld [vmem:[%s3526_s5 + $0xe0] sm:$0xff]  }
 0x133   :  { %1694 = vmatpush2.bf16.msra.mxu0 %v2602_v36  ;;  %v2682_v36 = vld [vmem:[%s3526_s5 + $0xa0] sm:$0xff]  }
 0x134   :  { %1725 = vmatpush1.bf16.msra.mxu1 %v2605_v38  ;;  %1695 = vmatprep.subr.bf16.mxu0 %v2610_v39  ;;  %v2683_v38 = vld [vmem:[%s3526_s5 + $0xd8] sm:$0xff]  }
 0x135   :  { %1726 = vmatprep.subr.bf16.mxu1 %v2613_v40  ;;  %v2684_v39 = vld [vmem:[%s3526_s5 + $0x98] sm:$0xff]   ;;  %v2685_v40 = vld [vmem:[%s3526_s5 + $0xd0] sm:$0xff]  }
 0x137   :  { %1696 = vmatpush2.bf16.msra.mxu0 %v2608_v41  ;;  %v2686_v41 = vld [vmem:[%s3526_s5 + $0x90] sm:$0xff]  }
 0x138   :  { %1727 = vmatpush1.bf16.msra.mxu1 %v2611_v42  ;;  %1697 = vmatprep.subr.bf16.mxu0 %v2616_v43  ;;  %v2687_v42 = vld [vmem:[%s3526_s5 + $0xc8] sm:$0xff]  }
 0x139   :  { %1728 = vmatprep.subr.bf16.mxu1 %v2619_v44  ;;  %v2688_v43 = vld [vmem:[%s3526_s5 + $0x88] sm:$0xff]   ;;  %v2689_v44 = vld [vmem:[%s3526_s5 + $0xc0] sm:$0xff]  }
 0x13b   :  { %1698 = vmatpush2.bf16.msra.mxu0 %v2614_v45  ;;  %v2690_v45 = vld [vmem:[%s3526_s5 + $0x80] sm:$0xff]  }
 0x13c   :  { %1729 = vmatpush1.bf16.msra.mxu1 %v2617_v46  ;;  %1699 = vmatprep.subr.bf16.mxu0 %v2622_v47 }
 0x13d   :  { %1730 = vmatprep.subr.bf16.mxu1 %v2625_v48 }
 0x13f   :  { %1700 = vmatpush2.bf16.msra.mxu0 %v2620_v49 }
 0x140   :  { %1731 = vmatpush1.bf16.msra.mxu1 %v2623_v50  ;;  %1701 = vmatprep.subr.bf16.mxu0 %v2628_v51  ;;  %v240_v50 = vld [vmem:[%s3528_s4] sm:$0xf] }
 0x141   :  { %1732 = vmatprep.subr.bf16.mxu1 %v2631_v53  ;;  %v936_v51 = vrot.slane %v240_v50, %v318_v35  ;;  %v940_v53 = vrot.slane %v240_v50, %v322_v37  ;;  %v944_v37 = vrot.slane %v240_v50, %v326_v55 }
 0x143   :  { %1702 = vmatpush2.bf16.msra.mxu0 %v2626_v54 }
 0x144   :  { %1733 = vmatpush2.bf16.msra.mxu1 %v2629_v56  ;;  %1703 = vmatprep.subr.bf16.mxu0 %v2634_v58 }
 0x145   :  { %1734 = vmatprep.subr.bf16.mxu1 %v2637_v59 }
 0x147   :  { %1704 = vmatpush2.bf16.msra.mxu0 %v2632_v60 }
 0x148   :  { %1735 = vmatpush2.bf16.msra.mxu1 %v2635_v61  ;;  %1705 = vmatprep.subr.bf16.mxu0 %v2640_v62 }
 0x149   :  { %1736 = vmatprep.subr.bf16.mxu1 %v2643_v63 }
 0x14b   :  { %1706 = vmatpush2.bf16.msra.mxu0 %v2638_v0 }
 0x14c   :  { %1737 = vmatpush2.bf16.msra.mxu1 %v2641_v2  ;;  %2296 = vmatprep.subr.bf16.mxu0 %v2659_v4 }
 0x14d   :  { %1738 = vmatprep.subr.bf16.mxu1 %v2646_v3 }
 0x14e   :  { %1708 = vmatmul.mubr.bf16.vlgmr.msra.gmra.mxu0 %v3213_v52  ;;  %v2650_v52 = vld [vmem:[%s3525_s3 + $0x348] ss:$16 sps:$4 sm:$0xff]  }
 0x14f   :  { %2297 = vmatpush3.bf16.msra.mxu0 %v2660_v6 }
 0x150   :  { %1739 = vmatpush2.bf16.msra.mxu1 %v2644_v5  ;;  %2298 = vmatprep.subr.bf16.mxu0 %v2661_v9 }
 0x151   :  { %1740 = vmatprep.subr.bf16.mxu1 %v2649_v7 }
 0x153   :  { %2299 = vmatpush3.bf16.msra.mxu0 %v2662_v11 }
 0x154   :  { %1741 = vmatpush2.bf16.msra.mxu1 %v2647_v8  ;;  %2300 = vmatprep.subr.bf16.mxu0 %v2663_v12  ;;  %v948_v8 = vrot.slane %v240_v50, %v330_v57  ;;  %v2263_v57 = vld [vmem:[%s3529_s6] ss:$0 sm:$0xff] }
 0x155   :  { %1742 = vmatprep.subr.bf16.mxu1 %v2652_v10 }
 0x157   :  { %2301 = vmatpush3.bf16.msra.mxu0 %v2664_v14 }
 0x158   :  { %1743 = vmatpush2.bf16.msra.mxu1 %v2650_v52  ;;  %2302 = vmatprep.subr.bf16.mxu0 %v2665_v15 }
 0x159   :  { %1744 = vmatprep.subr.bf16.mxu1 %v2655_v13 }
 0x15b   :  { %2303 = vmatpush3.bf16.msra.mxu0 %v2666_v17 }
 0x15c   :  { %1745 = vmatpush2.bf16.msra.mxu1 %v2653_v16  ;;  %2304 = vmatprep.subr.bf16.mxu0 %v2667_v19 }
 0x15d   :  { %1746 = vmatprep.subr.bf16.mxu1 %v2658_v18 }
 0x15f   :  { %2305 = vmatpush3.bf16.msra.mxu0 %v2668_v22 }
 0x160   :  { %1747 = vmatpush2.bf16.msra.mxu1 %v2656_v21  ;;  %2306 = vmatprep.subr.bf16.mxu0 %v2669_v1 }
 0x163   :  { %1749 = vmatmul.mubr.bf16.vlgmr.msra.gmra.mxu1 %v3255_v20  ;;  %2307 = vmatpush3.bf16.msra.mxu0 %v2670_v23  ;;  %v2675_v20 = vld [vmem:[%s3526_s5 + $0xf8] sm:$0xff]  }
 0x164   :  { %2308 = vmatprep.subr.bf16.mxu0 %v2671_v25  ;;  %2318 = vmatprep.subr.bf16.mxu1 %v2675_v20 }
 0x165   :  { %2319 = vmatpush3.bf16.msra.mxu1 %v2676_v29 }
 0x166   :  { %2320 = vmatprep.subr.bf16.mxu1 %v2677_v30 }
 0x167   :  { %2309 = vmatpush3.bf16.msra.mxu0 %v2672_v26 }
 0x168   :  { %2310 = vmatprep.subr.bf16.mxu0 %v2673_v27 }
 0x169   :  { %2321 = vmatpush3.bf16.msra.mxu1 %v2678_v31 }
 0x16a   :  { %2322 = vmatprep.subr.bf16.mxu1 %v2679_v32 }
 0x16b   :  { %2311 = vmatpush3.bf16.msra.mxu0 %v2674_v28 }
 0x16d   :  { %2323 = vmatpush3.bf16.msra.mxu1 %v2680_v33 }
 0x16e   :  { %2324 = vmatprep.subr.bf16.mxu1 %v2681_v24 }
 0x171   :  { %2325 = vmatpush3.bf16.msra.mxu1 %v2682_v36 }
 0x172   :  { %2326 = vmatprep.subr.bf16.mxu1 %v2683_v38 }
 0x175   :  { %2327 = vmatpush3.bf16.msra.mxu1 %v2684_v39 }
 0x176   :  { %2328 = vmatprep.subr.bf16.mxu1 %v2685_v40 }
 0x179   :  { %2329 = vmatpush3.bf16.msra.mxu1 %v2686_v41 }
 0x17a   :  { %2330 = vmatprep.subr.bf16.mxu1 %v2687_v42 }
 0x17d   :  { %2331 = vmatpush3.bf16.msra.mxu1 %v2688_v43 }
 0x17e   :  { %2332 = vmatprep.subr.bf16.mxu1 %v2689_v44 }
 0x181   :  { %2333 = vmatpush3.bf16.msra.mxu1 %v2690_v45 }
 0x1ce   :  { %v1627_v46 = vpop.f32.mrf.mxu0 }
 0x1cf   :  { %v1628_v54 = vadd.f32 %v1627_v46, %v936_v51 }
 0x1d0   :  { %v1629_v47 = vpop.f32.mrf.mxu0 }
 0x1d1   :  { %v1630_v58 = vadd.f32 %v1629_v47, %v940_v53 }
 0x1d2   :  { %v1631_v48 = vpop.f32.mrf.mxu0 }
 0x1d4   :  { %v1632_v49 = vpop.f32.mrf.mxu0 }
 0x1e3   :  { %v1668_v56 = vpop.f32.mrf.mxu1 }
 0x1e4   :  { %v1669_v59 = vadd.f32 %v1668_v56, %v1628_v54 }
 0x1e5   :  { %v1670_v60 = vpop.f32.mrf.mxu1 }
 0x1e6   :  { %v1671_v61 = vadd.f32 %v1670_v60, %v1630_v58  ;;  %v1757_v62 = vmax.f32 %v1669_v59, 0.0 }
 0x1e7   :  { %v1672_v63 = vpop.f32.mrf.mxu1 }
 0x1e8   :  { %v1758_v0 = vmax.f32 %v1671_v61, 0.0  ;;  %v1761_v4 = vpack.c.bf16 %v1757_v62, %v1757_v62 }
 0x1e9   :  { %v1673_v2 = vpop.f32.mrf.mxu1 }
 0x1ea   :  { %v1762_v3 = vpack.c.bf16 %v1758_v0, %v1758_v0 }
 0x1ec   :  { %1995 = vmatprep.mubr.bf16.mxu0 %v1762_v3 }
 0x1ed   :  { %1996 = vmatmul.mubr.bf16.vlgmr.msra.gmra.mxu0 %v1761_v4 }
 0x20e   :  { %v1709_v5 = vpop.f32.mrf.mxu0 }
 0x20f   :  { %v1710_v9 = vadd.f32 %v1709_v5, %v944_v37 }
 0x210   :  { %v1711_v6 = vpop.f32.mrf.mxu0 }
 0x211   :  { %v1712_v11 = vadd.f32 %v1711_v6, %v948_v8 }
 0x212   :  { %v1713_v35 = vpop.f32.mrf.mxu0 }
 0x214   :  { %v1714_v7 = vpop.f32.mrf.mxu0 }
 0x223   :  { %v1750_v10 = vpop.f32.mrf.mxu1 }
 0x224   :  { %v1751_v52 = vadd.f32 %v1750_v10, %v1710_v9 }
 0x225   :  { %v1752_v12 = vpop.f32.mrf.mxu1 }
 0x226   :  { %v1753_v13 = vadd.f32 %v1752_v12, %v1712_v11  ;;  %v1759_v14 = vmax.f32 %v1751_v52, 0.0 }
 0x227   :  { %v1754_v15 = vpop.f32.mrf.mxu1 }
 0x228   :  { %v1760_v16 = vmax.f32 %v1753_v13, 0.0  ;;  %v1763_v19 = vpack.c.bf16 %v1759_v14, %v1759_v14 }
 0x229   :  { %v1755_v17 = vpop.f32.mrf.mxu1 }
 0x22a   :  { %v1764_v18 = vpack.c.bf16 %v1760_v16, %v1760_v16 }
 0x22c   :  { %2035 = vmatprep.mubr.bf16.mxu1 %v1764_v18 }
 0x22d   :  { %2036 = vmatmul.mubr.bf16.vlgmr.msra.gmra.mxu1 %v1763_v19 }
 0x2ad   :  { %v2312_v21 = vpop.f32.mrf.mxu0 }
 0x2af   :  { %v2313_v22 = vpop.f32.mrf.mxu0 }
 0x2b0   :  { %v2314_v34 = vadd.f32 %v2313_v22, %v2312_v21 }
 0x2b1   :  { %v2315_v55 = vpop.f32.mrf.mxu0 }
 0x2b2   :  { %v1998_v26 = vadd.f32 %v2314_v34, %v2263_v57 }
 0x2b3   :  { %v2316_v1 = vpop.f32.mrf.mxu0 }
 0x2ed   :  { %v2334_v23 = vpop.f32.mrf.mxu1 }
 0x2ef   :  { %v2335_v25 = vpop.f32.mrf.mxu1 }
 0x2f0   :  { %v2336_v27 = vadd.f32 %v2335_v25, %v2334_v23 }
 0x2f1   :  { %v2337_v28 = vpop.f32.mrf.mxu1 }
 0x2f2   :  { %v2038_v20 = vadd.f32 %v2336_v27, %v1998_v26 }
 0x2f3   :  { %v2338_v29 = vpop.f32.mrf.mxu1 }
 0x2f4   :  { %2044 = vst.msk [vmem:[%s3530_s7] sm:$0xff] %vm2043_vm1, %v2038_v20 }

</bundles_post_ra>
